<compile_context>
chip_gen: v7x
topology: tpu7x:2x2x1
jax: 0.10.0
libtpu: 0.0.40
codegen_flags: <defaults>
</compile_context>

<pallas_src>
import functools

import jax
import jax.numpy as jnp
from jax.experimental import pallas as pl
from jax.experimental.pallas import tpu as pltpu


def make_inv_freq(dim, base=10000.0):
    """Deterministic parameter init, same formula as Rotary.__init__."""
    return 1.0 / (base ** (jnp.arange(0, dim, 2, dtype=jnp.float32) / dim))


def _choose_fold(seq_len, half, target_width=512):
    """Largest power-of-two fold factor <= target_width//half dividing seq_len."""
    f_max = max(1, target_width // max(half, 1))
    f = 1
    while f * 2 <= f_max and seq_len % (f * 2) == 0:
        f *= 2
    return f


def _rotary_kernel(col_t_ref, inv_ref, cos_ref, sin_ref, *, fold):
    # col_t_ref: (1, W) = column -> folded row offset (0..fold-1), f32
    # inv_ref:   (1, W) = column -> inv_freq[col % half], f32
    # cos_ref / sin_ref: (tile_rows, W) f32, lane-dense outputs.
    tile_rows, width = cos_ref.shape
    row0 = pl.program_id(0) * (tile_rows * fold)            # int32 scalar
    r = jax.lax.broadcasted_iota(jnp.int32, (tile_rows, width), 0)
    # Exact integer sequence position (f32-exact below 2^24), one multiply.
    t = (r * fold + row0).astype(jnp.float32) + col_t_ref[...]
    freqs = t * inv_ref[...]
    cos_ref[...] = jnp.cos(freqs)
    sin_ref[...] = jnp.sin(freqs)


def rotary_forward(x, inv_freq, block_rows_hint=None):
    """Mirror of Rotary.forward: returns (cos, sin) of shape (1, T, 1, dim//2)."""
    seq_len = x.shape[1]
    half = inv_freq.shape[0]

    fold = _choose_fold(seq_len, half)
    width = fold * half
    rows = seq_len // fold                      # exact: fold divides seq_len

    # ~2 MiB of output per grid step per array unless the caller overrides
    # (block_rows_hint is in *original* table rows, i.e. sequence positions).
    if block_rows_hint is None:
        block_rows_hint = max(1024, (2 << 20) // (4 * half))
    tile_rows = max(8, ((block_rows_hint // fold) // 8) * 8)
    if tile_rows >= rows:
        tile_rows = rows                        # full extent -> always legal
        grid = 1
    else:
        grid = pl.cdiv(rows, tile_rows)         # ragged last block is clipped

    col = jnp.arange(width, dtype=jnp.int32) // half
    col_t = col.astype(jnp.float32).reshape(1, width)
    inv_folded = jnp.tile(inv_freq.astype(jnp.float32), fold).reshape(1, width)

    vec_spec = pl.BlockSpec((1, width), lambda i: (0, 0))
    out_spec = pl.BlockSpec((tile_rows, width), lambda i: (i, 0))

    cos_f, sin_f = pl.pallas_call(
        functools.partial(_rotary_kernel, fold=fold),
        out_shape=(jax.ShapeDtypeStruct((rows, width), jnp.float32),
                   jax.ShapeDtypeStruct((rows, width), jnp.float32)),
        grid=(grid,),
        in_specs=[vec_spec, vec_spec],
        out_specs=[out_spec, out_spec],
        compiler_params=pltpu.CompilerParams(
            dimension_semantics=("parallel",)),
        cost_estimate=pl.CostEstimate(
            flops=2 * seq_len * half,
            transcendentals=2 * seq_len * half,
            bytes_accessed=2 * seq_len * half * 4 + 2 * width * 4),
    )(col_t, inv_folded)

    # Contiguous (layout-preserving) un-fold + broadcast dims; no slicing.
    cos = cos_f.reshape(1, seq_len, 1, half)
    sin = sin_f.reshape(1, seq_len, 1, half)
    return cos, sin


def _jax_reference(seq_len, inv_freq):
    t = jnp.arange(seq_len, dtype=jnp.float32)
    freqs = jnp.outer(t, inv_freq)
    return jnp.cos(freqs)[None, :, None, :], jnp.sin(freqs)[None, :, None, :]


if __name__ == "__main__":
    # Small shapes consistent with the module: x = (batch, seq, heads, head_dim)
    B, T, H, D = 2, 8, 4, 32
    key = jax.random.PRNGKey(0)
    x = jax.random.normal(key, (B, T, H, D), dtype=jnp.float32)
    inv_freq = make_inv_freq(D)

    cos, sin = jax.block_until_ready(rotary_forward(x, inv_freq))
    cos_ref, sin_ref = _jax_reference(T, inv_freq)
    assert cos.shape == (1, T, 1, D // 2) and cos.dtype == jnp.float32
    assert sin.shape == (1, T, 1, D // 2) and sin.dtype == jnp.float32
    assert jnp.allclose(cos, cos_ref, atol=1e-5)
    assert jnp.allclose(sin, sin_ref, atol=1e-5)

    # Non-power-of-two sequence length: fold falls back to 2, multi-step grid
    # with a ragged (clipped) last block; no padding / slicing in the wrapper.
    T2 = 2050
    x2 = jnp.zeros((1, T2, H, D), dtype=jnp.float32)
    cos2, sin2 = jax.block_until_ready(
        rotary_forward(x2, inv_freq, block_rows_hint=512))
    cos2_ref, sin2_ref = _jax_reference(T2, inv_freq)
    assert cos2.shape == (1, T2, 1, D // 2)
    assert jnp.allclose(cos2, cos2_ref, atol=2e-4)
    assert jnp.allclose(sin2, sin2_ref, atol=2e-4)

    # Power-of-two sequence: full lane folding (width 512) + multi-step grid.
    T3, D3 = 4096, 64
    inv3 = make_inv_freq(D3)
    x3 = jnp.zeros((1, T3, H, D3), dtype=jnp.float32)
    cos3, sin3 = jax.block_until_ready(
        rotary_forward(x3, inv3, block_rows_hint=1024))
    cos3_ref, sin3_ref = _jax_reference(T3, inv3)
    assert cos3.shape == (1, T3, 1, D3 // 2)
    assert jnp.allclose(cos3, cos3_ref, atol=2e-4)
    assert jnp.allclose(sin3, sin3_ref, atol=2e-4)

    print("KERNEL_OK")
</pallas_src>

<mosaic_0001>
module attributes {stable_mosaic.version = 11 : i64} {
  func.func @_rotary_kernel(%arg0: i32, %arg1: memref<1x128xf32, #tpu.memory_space<vmem>>, %arg2: memref<1x128xf32, #tpu.memory_space<vmem>>, %arg3: memref<1x128xf32, #tpu.memory_space<vmem>>, %arg4: memref<1x128xf32, #tpu.memory_space<vmem>>) attributes {dimension_semantics = [#tpu.dimension_semantics<parallel>], iteration_bounds = array<i64: 1>, scalar_prefetch = 0 : i64, scratch_operands = 0 : i64, tpu.core_type = #tpu.core_type<tc>, window_params = [{pipeline_mode = #tpu.pipeline_mode<synchronous>, transform_indices = @transform_0, window_bounds = array<i64: 1, 128>}, {pipeline_mode = #tpu.pipeline_mode<synchronous>, transform_indices = @transform_1, window_bounds = array<i64: 1, 128>}, {transform_indices = @transform_2, window_bounds = array<i64: 1, 128>}, {transform_indices = @transform_3, window_bounds = array<i64: 1, 128>}]} {
    %c8_i32 = arith.constant 8 : i32
    %0 = arith.muli %arg0, %c8_i32 : i32
    %1 = tpu.iota {dimensions = array<i32: 0>} : vector<1x128xi32>
    %c8_i32_0 = arith.constant 8 : i32
    %2 = vector.broadcast %c8_i32_0 : i32 to vector<1x128xi32>
    %3 = arith.muli %1, %2 : vector<1x128xi32>
    %4 = vector.broadcast %0 : i32 to vector<1x128xi32>
    %5 = arith.addi %3, %4 : vector<1x128xi32>
    %6 = arith.sitofp %5 : vector<1x128xi32> to vector<1x128xf32>
    %c0 = arith.constant 0 : index
    %c0_1 = arith.constant 0 : index
    %7 = vector.load %arg1[%c0, %c0_1] : memref<1x128xf32, #tpu.memory_space<vmem>>, vector<1x128xf32>
    %8 = arith.addf %6, %7 : vector<1x128xf32>
    %c0_2 = arith.constant 0 : index
    %c0_3 = arith.constant 0 : index
    %9 = vector.load %arg2[%c0_2, %c0_3] : memref<1x128xf32, #tpu.memory_space<vmem>>, vector<1x128xf32>
    %10 = arith.mulf %8, %9 : vector<1x128xf32>
    %11 = math.cos %10 : vector<1x128xf32>
    %c0_4 = arith.constant 0 : index
    %c0_5 = arith.constant 0 : index
    %12 = vector.load %arg3[%c0_4, %c0_5] : memref<1x128xf32, #tpu.memory_space<vmem>>, vector<1x128xf32>
    tpu.vector_store %arg3[%c0_4, %c0_5], %11 {strides = array<i32>} : memref<1x128xf32, #tpu.memory_space<vmem>>, vector<1x128xf32>,
    %13 = math.sin %10 : vector<1x128xf32>
    %c0_6 = arith.constant 0 : index
    %c0_7 = arith.constant 0 : index
    %14 = vector.load %arg4[%c0_6, %c0_7] : memref<1x128xf32, #tpu.memory_space<vmem>>, vector<1x128xf32>
    tpu.vector_store %arg4[%c0_6, %c0_7], %13 {strides = array<i32>} : memref<1x128xf32, #tpu.memory_space<vmem>>, vector<1x128xf32>,
    return
  }
  func.func @transform_0(%arg0: i32) -> (i32, i32) {
    %c0_i32 = arith.constant 0 : i32
    %c0_i32_0 = arith.constant 0 : i32
    %c0_i32_1 = arith.constant 0 : i32
    return %c0_i32, %c0_i32_0 : i32, i32
  }
  func.func @transform_1(%arg0: i32) -> (i32, i32) {
    %c0_i32 = arith.constant 0 : i32
    %c0_i32_0 = arith.constant 0 : i32
    %c0_i32_1 = arith.constant 0 : i32
    return %c0_i32, %c0_i32_0 : i32, i32
  }
  func.func @transform_2(%arg0: i32) -> (i32, i32) {
    %c0_i32 = arith.constant 0 : i32
    %c0_i32_0 = arith.constant 0 : i32
    return %arg0, %c0_i32 : i32, i32
  }
  func.func @transform_3(%arg0: i32) -> (i32, i32) {
    %c0_i32 = arith.constant 0 : i32
    %c0_i32_0 = arith.constant 0 : i32
    return %arg0, %c0_i32 : i32, i32
  }
}

</mosaic_0001>

<bundles_post_ra>
// kernel: tpu_custom_call.1
= control target key start
LH: loop header
LB: loop body
LE: loop exit
PB: predicated region body
PF: predicated region fallthrough
CT: control target
= control target key end

     0   :  { %9 = vsyncpa [#allocation3], 0  ;;  %s470_s0 = inlined_call_operand.hbm [shape: f32[1,128], index: 0, kind: input, shape index: {}]   ;;  %s471_s1 = inlined_call_operand.vmem [shape: f32[1,128], index: 1, kind: input, shape index: {}]   ;;  %s472_s2 = inlined_call_operand.hbm [shape: f32[1,128], index: 2, kind: output, shape index: {0}]   ;;  %s473_s3 = inlined_call_operand.hbm [shape: f32[1,128], index: 3, kind: output, shape index: {1}]  }
   0x1   :  { %10 = vsyncpa [#allocation4], 0 }
   0x2   :  { %11 = vsyncpa [#allocation7], 0  ;;  %s373_s12 = smov [#allocation2]   ;;  %s301_s16 = scalar_lea.hbm %s470_s0, 16 }
   0x3   :  { %s18_s13 = sshll.u32 %s373_s12, 4  ;;  %p302_p0 = scmp.ne.s32.totalorder %s470_s0, %s301_s16  ;;  %s19_s13 = int_to_ptr.vmem [resolvable:$true] %s18_s13 }
   0x4   :  { %p305_p1 = scmp.lt.u32.totalorder %s301_s16, %s470_s0 }
   0x6   :  { %p307_p2 = pnand %p305_p1, %p302_p0 }
   0x8   :  { %310 = shalt.err (!%p307_p2)
}
   0x9   :  { %s311_s21 = scalar_lea.vmem %s19_s13, 16  ;;  %s315_s22 = scalar_lea.vmem %s19_s13, 32 }
   0xa   :  { %p312_p3 = scmp.ne.s32.totalorder %s19_s13, %s311_s21  ;;  %p316_p4 = scmp.lt.s32.totalorder %s19_s13, %s19_s13 }
   0xb   :  { %p317_p5 = scmp.lt.s32.totalorder %s315_s22, %s311_s21 }
   0xd   :  { %p318_p6 = por %p317_p5, %p316_p4 }
   0xf   :  { %p319_p7 = pnand %p318_p6, %p312_p3 }
  0x11   :  { %322 = shalt.err (!%p319_p7)
}
  0x12   :  { %21 = dma.hbm_to_vmem [thread:$0]  %s470_s0, 16, %s19_s13, [#allocation3]  }
  0x13   :  { %367 = dma.done.wait [#allocation3], 16  }
  0x14   :  { %368 = vsyncadd [#allocation3], 4294967280  ;;  %v28_v0 = vlaneseq  ;;  %v34_v4 = vld [vmem:[#allocation2] sm:$0x1]  ;;  %v374_v19 = vmov 683565275  }
  0x15   :  { %v36_v5 = vld [vmem:[%s471_s1] sm:$0x1]  ;;  %v375_v21 = vmov 2475754826   ;;  %v376_v23 = vmov 2131351028  }
  0x16   :  { %v29_v1 = vshrl.u32 %v28_v0, 7  ;;  %v377_v25 = vmov 2102212464   ;;  %v378_v27 = vmov 920167782   ;;  %s380_s0 = smov [#allocation5]  }
  0x17   :  { %v379_v34 = vmov 1326507024   ;;  %s253_s1 = sshll.u32 %s380_s0, 4  ;;  %s381_s27 = smov [#allocation6]   ;;  %s254_s1 = int_to_ptr.vmem [resolvable:$true] %s253_s1 }
  0x18   :  { %v30_v2 = vmul.u32 8, %v29_v1  ;;  %s263_s28 = sshll.u32 %s381_s27, 4  ;;  %s323_s29 = scalar_lea.vmem %s254_s1, 16  ;;  %s438_s28 = int_to_ptr.vmem [resolvable:$true] %s263_s28 }
  0x19   :  { %p324_p8 = scmp.ne.s32.totalorder %s254_s1, %s323_s29  ;;  %s327_s30 = scalar_lea.vmem %s254_s1, 32 }
  0x1a   :  { %v33_v3 = vcvt.s32.f32 %v30_v2  ;;  %p328_p9 = scmp.lt.s32.totalorder %s254_s1, %s254_s1  ;;  %p329_p10 = scmp.lt.s32.totalorder %s327_s30, %s323_s29 }
  0x1c   :  { %v35_v6 = vadd.f32 %v34_v4, %v33_v3  ;;  %p330_p11 = por %p329_p10, %p328_p9 }
  0x1e   :  { %v417_v7 = vmul.f32 %v36_v5, %v35_v6  ;;  %p331_p12 = pnand %p330_p11, %p324_p8 }
  0x20   :  { %v41_v8 = vand.u32 2139095040, %v417_v7  ;;  %v38_v10 = vand.u32 2147483647, %v417_v7  ;;  %vm40_vm7 = vcmp.lt.s32.totalorder %v417_v7, 0  ;;  %vm130_vm15 = vweird.f32 %v417_v7 }
  0x22   :  { %v42_v9 = vshrl.u32 %v41_v8, 23  ;;  %v45_v13 = vand.u32 8388607, %v38_v10  ;;  %vm39_vm8 = vcmp.le.f32.partialorder %v38_v10, 0.7853982 }
  0x24   :  { %v276_v11 = vadd.s32 4294967169, %v42_v9  ;;  %v46_v16 = vor.u32 8388608, %v45_v13 }
  0x26   :  { %v48_v12 = vadd.s32 1, %v276_v11  ;;  %v86_v36 = vshll.u32 %v46_v16, 8 }
  0x28   :  { %vm49_vm0 = vcmp.gt.s32.totalorder %v48_v12, 0 }
  0x29   :  { %v50_v14 = vsel %vm49_vm0, %v48_v12, 0 }
  0x2a   :  { %v52_v15 = vand.u32 31, %v50_v14  ;;  %v51_v17 = vshrl.u32 %v50_v14, 5 }
  0x2c   :  { %v53_v18 = vsub.s32 32, %v52_v15  ;;  %v55_v20 = vshll.u32 %v374_v19, %v52_v15  ;;  %v58_v22 = vshll.u32 %v375_v21, %v52_v15  ;;  %v61_v24 = vshll.u32 %v376_v23, %v52_v15 }
  0x2d   :  { %v64_v26 = vshll.u32 %v377_v25, %v52_v15  ;;  %v67_v28 = vshll.u32 %v378_v27, %v52_v15  ;;  %vm70_vm1 = vcmp.lt.s32.totalorder %v51_v17, 1  ;;  %vm73_vm2 = vcmp.lt.s32.totalorder %v51_v17, 4 }
  0x2e   :  { %v54_v29 = vshrl.u32 %v374_v19, %v53_v18  ;;  %v56_v30 = vshrl.u32 %v375_v21, %v53_v18  ;;  %v59_v31 = vshrl.u32 %v376_v23, %v53_v18  ;;  %v62_v32 = vshrl.u32 %v377_v25, %v53_v18 }
  0x2f   :  { %v65_v33 = vshrl.u32 %v378_v27, %v53_v18  ;;  %v68_v35 = vshrl.u32 %v379_v34, %v53_v18  ;;  %vm71_vm3 = vcmp.lt.s32.totalorder %v51_v17, 2  ;;  %vm72_vm4 = vcmp.lt.s32.totalorder %v51_v17, 3 }
  0x30   :  { %v57_v37 = vor.u32 %v56_v30, %v55_v20  ;;  %v60_v38 = vor.u32 %v59_v31, %v58_v22  ;;  %v63_v39 = vor.u32 %v62_v32, %v61_v24 }
  0x31   :  { %v66_v40 = vor.u32 %v65_v33, %v64_v26  ;;  %v69_v41 = vor.u32 %v68_v35, %v67_v28 }
  0x32   :  { %v74_v42 = vsel %vm70_vm1, %v54_v29, %v57_v37  ;;  %v75_v43 = vsel %vm73_vm2, %v63_v39, 2102212464  ;;  %v78_v44 = vsel %vm70_vm1, %v57_v37, %v60_v38  ;;  %v82_v45 = vsel %vm70_vm1, %v60_v38, %v63_v39 }
  0x33   :  { %v76_v46 = vsel %vm72_vm4, %v60_v38, %v75_v43  ;;  %v79_v47 = vsel %vm73_vm2, %v66_v40, 920167782  ;;  %v83_v48 = vsel %vm73_vm2, %v69_v41, 1326507024 }
  0x34   :  { %v80_v49 = vsel %vm72_vm4, %v63_v39, %v79_v47  ;;  %v84_v50 = vsel %vm72_vm4, %v66_v40, %v83_v48  ;;  %v77_v51 = vsel %vm71_vm3, %v74_v42, %v76_v46 }
  0x35   :  { %v81_v52 = vsel %vm71_vm3, %v78_v44, %v80_v49  ;;  %v85_v53 = vsel %vm71_vm3, %v82_v45, %v84_v50  ;;  %v93_v58 = vmul.u32 %v86_v36, %v77_v51 }
  0x36   :  { %v423_v54 = vmul.u32.u64.low %v86_v36, %v85_v53  ;;  %v424_v55 = vmul.u32.u64.high %v86_v36, %v85_v53, %v423_v54  ;;  %v426_v56 = vmul.u32.u64.low %v86_v36, %v81_v52  ;;  %v427_v57 = vmul.u32.u64.high %v86_v36, %v81_v52, %v426_v56 }
  0x38   :  { %vm95_vm5 = vc.u32 %v424_v55, %v426_v56  ;;  %v96_v59 = vadd.s32 1, %v427_v57  ;;  %v94_v6 = vadd.s32 %v426_v56, %v424_v55 }
  0x3a   :  { %v97_v60 = vsel %vm95_vm5, %v96_v59, %v427_v57 }
  0x3b   :  { %v98_v61 = vadd.s32 %v97_v60, %v93_v58 }
  0x3d   :  { %v99_v62 = vadd.s32 536870912, %v98_v61 }
  0x3f   :  { %v100_v63 = vshrl.u32 %v99_v62, 30 }
  0x41   :  { %v101_v0 = vshll.u32 %v100_v63, 30  ;;  %v124_v20 = vsub.s32 4, %v100_v63 }
  0x43   :  { %v102_v1 = vsub.s32 %v98_v61, %v101_v0  ;;  %v125_v23 = vsel %vm40_vm7, %v124_v20, %v100_v63 }
  0x44   :  { %v127_v26 = vsel %vm39_vm8, 0, %v125_v23 }
  0x45   :  { %v104_v2 = vsub.s32 0, %v102_v1  ;;  %v235_v27 = vadd.s32 3, %v127_v26  ;;  %v131_v28 = vand.u32 3, %v127_v26 }
  0x47   :  { %v277_v3 = vmin.u32 %v104_v2, %v102_v1  ;;  %v236_v29 = vand.u32 3, %v235_v27  ;;  %vm136_vm9 = vcmp.eq.s32.totalorder %v131_v28, 2  ;;  %vm133_vm11 = vcmp.eq.s32.totalorder %v131_v28, 0 }
  0x48   :  { %vm132_vm13 = vcmp.lt.s32.totalorder %v131_v28, 2 }
  0x49   :  { %v106_v4 = vclz %v277_v3  ;;  %vm241_vm10 = vcmp.eq.s32.totalorder %v236_v29, 2  ;;  %vm238_vm12 = vcmp.eq.s32.totalorder %v236_v29, 0  ;;  %vm237_vm14 = vcmp.lt.s32.totalorder %v236_v29, 2 }
  0x4b   :  { %v278_v5 = vadd.s32 4294967294, %v106_v4 }
  0x4d   :  { %vm279_vm6 = vcmp.lt.s32.totalorder %v278_v5, 0 }
  0x4e   :  { %v109_v8 = vsel %vm279_vm6, 0, %v278_v5 }
  0x4f   :  { %v110_v9 = vsub.s32 32, %v109_v8  ;;  %v111_v11 = vshll.u32 %v102_v1, %v109_v8  ;;  %v114_v12 = vsub.s32 4294967266, %v109_v8 }
  0x51   :  { %v112_v13 = vshrl.u32 %v94_v6, %v110_v9  ;;  %v115_v14 = vadd.s32 127, %v114_v12 }
  0x53   :  { %v113_v15 = vor.u32 %v112_v13, %v111_v11  ;;  %v116_v16 = vshll.u32 %v115_v14, 23 }
  0x55   :  { %v117_v17 = vor.u32 4788187, %v116_v16  ;;  %v120_v18 = vcvt.s32.f32 %v113_v15 }
  0x57   :  { %v118_v19 = vand.u32 2147483647, %v117_v17 }
  0x59   :  { %v121_v21 = vmul.f32 %v120_v18, %v118_v19 }
  0x5b   :  { %v122_v22 = vxor.u32 2147483648, %v121_v21 }
  0x5d   :  { %v123_v24 = vsel %vm40_vm7, %v122_v22, %v121_v21 }
  0x5e   :  { %v126_v25 = vsel %vm39_vm8, %v417_v7, %v123_v24 }
  0x5f   :  { %297 = vcosq.f32 %v126_v25 }
  0x60   :  { %299 = vsinq.f32 %v126_v25 }
  0x69   :  { %v298_v30 = vpop.eup %297 }
  0x6a   :  { %v300_v31 = vpop.eup %299  ;;  %v137_v32 = vxor.u32 2147483648, %v298_v30 }
  0x6b   :  { %v134_v10 = vxor.u32 2147483648, %v300_v31 }
  0x6c   :  { %v138_v33 = vsel %vm136_vm9, %v137_v32, %v300_v31  ;;  %v243_v34 = vsel %vm241_vm10, %v137_v32, %v300_v31 }
  0x6d   :  { %v135_v35 = vsel %vm133_vm11, %v298_v30, %v134_v10  ;;  %v240_v36 = vsel %vm238_vm12, %v298_v30, %v134_v10 }
  0x6e   :  { %v139_v37 = vsel %vm132_vm13, %v135_v35, %v138_v33  ;;  %v244_v38 = vsel %vm237_vm14, %v240_v36, %v243_v34 }
  0x6f   :  { %v140_v39 = vsel %vm130_vm15, nan, %v139_v37  ;;  %v245_v40 = vsel %vm130_vm15, nan, %v244_v38 }
  0x70   :  { %141 = vst [vmem:[#allocation5] sm:$0x1] %v140_v39  ;;  %246 = vst [vmem:[#allocation6] sm:$0x1] %v245_v40 }
  0x71   :  { %334 = shalt.err (!%p331_p12)
}
  0x72   :  { %s335_s6 = scalar_lea.hbm %s472_s2, 16 }
  0x73   :  { %p336_p13 = scmp.ne.s32.totalorder %s472_s2, %s335_s6  ;;  %p339_p0 = scmp.lt.u32.totalorder %s335_s6, %s472_s2 }
  0x75   :  { %p341_p1 = pnand %p339_p0, %p336_p13 }
  0x77   :  { %344 = shalt.err (!%p341_p1)
}
  0x78   :  { %256 = dma.vmem_to_hbm [thread:$0]  %s254_s1, 16, %s472_s2, [#allocation4]  }
  0x79   :  { %s345_s13 = scalar_lea.vmem %s438_s28, 16  ;;  %s349_s14 = scalar_lea.vmem %s438_s28, 32 }
  0x7a   :  { %p346_p2 = scmp.ne.s32.totalorder %s438_s28, %s345_s13  ;;  %p350_p3 = scmp.lt.s32.totalorder %s438_s28, %s438_s28 }
  0x7b   :  { %p351_p4 = scmp.lt.s32.totalorder %s349_s14, %s345_s13 }
  0x7d   :  { %p352_p5 = por %p351_p4, %p350_p3 }
  0x7f   :  { %p353_p6 = pnand %p352_p5, %p346_p2 }
  0x81   :  { %356 = shalt.err (!%p353_p6)
}
  0x82   :  { %s357_s17 = scalar_lea.hbm %s473_s3, 16 }
  0x83   :  { %p358_p7 = scmp.ne.s32.totalorder %s473_s3, %s357_s17  ;;  %p361_p8 = scmp.lt.u32.totalorder %s357_s17, %s473_s3 }
  0x85   :  { %p363_p9 = pnand %p361_p8, %p358_p7 }
  0x87   :  { %366 = shalt.err (!%p363_p9)
}
  0x88   :  { %266 = dma.vmem_to_hbm [thread:$0]  %s438_s28, 16, %s473_s3, [#allocation7]  }
  0x89   :  { %369 = dma.done.wait [#allocation4], 16  }
  0x8a   :  { %370 = vsyncadd [#allocation4], 4294967280 }
  0x8b   :  { %371 = dma.done.wait [#allocation7], 16  }
  0x8c   :  { %372 = vsyncadd [#allocation7], 4294967280 }
  0x8d   :  { %273 = vsyncpa [#allocation3], 1 }
  0x8e   :  { %274 = vsyncpa [#allocation4], 1 }
  0x8f   :  { %275 = vsyncpa [#allocation7], 1 }

</bundles_post_ra>
